<compile_context>
chip_gen: v7x
topology: tpu7x:2x2x1
jax: 0.10.0
libtpu: 0.0.40
codegen_flags: <defaults>
</compile_context>

<pallas_src>
import jax
import jax.numpy as jnp
from jax.scipy.linalg import solve_triangular
from jax.experimental import pallas as pl
from jax.experimental.pallas import tpu as pltpu


def _round_up(a: int, b: int) -> int:
    return (a + b - 1) // b * b


# ---------------------------------------------------------------------------
# Q construction: compact-WY form of torch.linalg.householder_product.
# Call this once per parameter update and cache / pass via `q=`.
# ---------------------------------------------------------------------------
def householder_q(vectors, dim, out_dtype=jnp.float32):
    """Q = H_1 @ ... @ H_k, H_i = I - 2 v_i v_i^T (LAPACK orgqr semantics).

    Reflector v_i is the i-th column of A with an implicit unit diagonal and
    zeros above it (A = row-normalized `vectors`, padded/truncated to square),
    exactly like torch.linalg.householder_product(A, tau=2).

    Compact-WY:
        V[:, i] = [0]*i ++ [1] ++ A[i+1:, i]
        T^{-1}  = diag(1/tau) + striu(V^T V),  tau_i = 2
        Q       = I - V (T V^T)
    """
    m = vectors.shape[0]
    v = vectors.astype(jnp.float32)
    norm = jnp.linalg.norm(v, axis=1, keepdims=True)
    # Exactly-zero reflector rows would be NaN in the torch module too; the
    # clamp only guards that degenerate case.
    v_normed = v / jnp.maximum(norm, jnp.finfo(jnp.float32).tiny)

    if m < dim:
        A = jnp.concatenate(
            [v_normed, jnp.zeros((dim - m, dim), jnp.float32)], axis=0)
    else:
        A = v_normed[:dim, :]
    k = min(m, dim)

    rows = jnp.arange(dim)[:, None]
    cols = jnp.arange(k)[None, :]
    V = jnp.where(rows > cols, A[:, :k], 0.0) + (rows == cols).astype(jnp.float32)

    S = V.T @ V                                                   # (k, k)
    Minv = 0.5 * jnp.eye(k, dtype=jnp.float32) + jnp.triu(S, 1)   # = T^{-1}
    TVt = solve_triangular(Minv, V.T, lower=False)                # T @ V^T
    Q = jnp.eye(dim, dtype=jnp.float32) - V @ TVt                 # (dim, dim)
    return Q.astype(out_dtype)


# ---------------------------------------------------------------------------
# Kernels
# ---------------------------------------------------------------------------
def _make_linear_kernel(compute_dtype):
    """Full K depth per output tile: out = x @ Q + bias (no scratch)."""
    def kernel(x_ref, q_ref, b_ref, o_ref):
        acc = jnp.dot(x_ref[...].astype(compute_dtype), q_ref[...],
                      preferred_element_type=jnp.float32)
        o_ref[...] = (acc + b_ref[...]).astype(o_ref.dtype)
    return kernel


def _make_linear_acc_kernel(compute_dtype, dim, tk):
    """K-reduction grid axis with an f32 VMEM accumulator scratch."""
    ragged_k = (dim % tk) != 0

    def kernel(x_ref, q_ref, b_ref, o_ref, acc_ref):
        k = pl.program_id(2)

        @pl.when(k == 0)
        def _init():
            acc_ref[...] = jnp.zeros_like(acc_ref)

        xb = x_ref[...].astype(compute_dtype)
        qb = q_ref[...]
        if ragged_k:
            # Out-of-bounds K lanes of the last tile hold garbage; zero them on
            # both operands so NaN/Inf garbage cannot pollute the accumulator.
            kcol = k * tk + jax.lax.broadcasted_iota(jnp.int32, xb.shape, 1)
            xb = jnp.where(kcol < dim, xb, jnp.zeros_like(xb))
            krow = k * tk + jax.lax.broadcasted_iota(jnp.int32, qb.shape, 0)
            qb = jnp.where(krow < dim, qb, jnp.zeros_like(qb))

        acc_ref[...] += jnp.dot(xb, qb, preferred_element_type=jnp.float32)

        @pl.when(k == pl.num_programs(2) - 1)
        def _finalize():
            o_ref[...] = (acc_ref[...] + b_ref[...]).astype(o_ref.dtype)

    return kernel


# ---------------------------------------------------------------------------
# Tile selection (VMEM-budget driven, per TPU generation)
# ---------------------------------------------------------------------------
def _vmem_need(tm, tn, tk, dim, x_isz, ci, oi, q_bufs):
    k_tiled = tk < dim
    b = 2 * tm * tk * x_isz          # x blocks (double-buffered)
    b += q_bufs * tk * tn * ci       # Q blocks
    b += 2 * tn * 4                  # bias blocks (f32)
    b += 2 * tm * tn * oi            # output blocks
    b += tm * tn * 4                 # in-kernel f32 matmul result temp
    if k_tiled:
        b += tm * tn * 4             # f32 accumulator scratch
    if ci != x_isz:
        b += tm * tk * ci            # in-kernel cast temp
    return b + (2 << 20)             # Mosaic internal scratch / misc


def _pick_tiles(M, dim, n_out, x_isz, ci, oi, budget):
    """Return (tm, tn, tk).  tk == dim -> no K-reduction axis; tn == n_out ->
    Q fully resident along N."""
    m_cap = max(8, _round_up(min(M, 2048), 8))
    tm_cands = [t for t in (2048, 1024, 512, 256, 128, 64, 32, 16, 8) if t <= m_cap]
    if m_cap not in tm_cands:
        tm_cands.append(m_cap)
    tm_cands = sorted(set(tm_cands), reverse=True)

    # 1) Fully-resident Q (single-buffered: its block index never changes).
    tm_floor = min(256, m_cap)
    for tm in tm_cands:
        if tm < tm_floor:
            break
        if _vmem_need(tm, n_out, dim, dim, x_isz, ci, oi, 1) <= budget:
            return tm, n_out, dim

    # 2) N-tiled. Q is re-streamed once per row tile, so maximize tm first
    #    (cuts Q HBM traffic); at a given tm prefer the deepest K block that
    #    fits (full-K avoids the accumulator RMW and extra grid steps).
    tn = min(512, n_out)
    for tm in tm_cands:
        for tk in (dim, 1024, 512, 256, 128):
            if tk > dim:
                continue
            if _vmem_need(tm, tn, tk, dim, x_isz, ci, oi, 2) <= budget:
                return tm, tn, tk

    # Last resort (should be unreachable for sane shapes).
    return tm_cands[-1], min(128, n_out), (dim if dim <= 128 else 128)


# ---------------------------------------------------------------------------
# Wrapper
# ---------------------------------------------------------------------------
def householder_linear(x, vectors=None, bias=None, *, q=None, mxu_dtype=None,
                       tm=None, tn=None, tk=None):
    """Pallas-backed forward: x @ Q + bias, Q from Householder reflections.

    q:          optional precomputed Q (cache householder_q per weight update).
    mxu_dtype:  e.g. jnp.bfloat16 for the MXU fast path (f32 accumulation is
                kept; the x tile is cast on the VPU inside the kernel, so no
                extra HBM pass over x). Default None keeps the input dtype.
    """
    dim = x.shape[-1]
    assert (vectors is not None) or (q is not None)
    if vectors is not None:
        assert vectors.shape[1] == dim, (vectors.shape, dim)

    out_dtype = x.dtype
    compute_dtype = jnp.dtype(mxu_dtype) if mxu_dtype is not None else jnp.dtype(out_dtype)

    if q is None:
        q = householder_q(vectors, dim, out_dtype=compute_dtype)
    else:
        q = q.astype(compute_dtype)

    lead = x.shape[:-1]
    x2 = x.reshape(-1, dim)            # no dtype cast here (cast per-tile in-kernel)
    M = x2.shape[0]

    # Output columns: dim >= 128 stores straight into (M, dim) (only the last
    # ragged N tile is lane-masked); tiny dims pad Q/bias columns to 128 for
    # lane-dense stores and slice the (tiny) result back.
    n_out = dim if dim >= 128 else 128
    if n_out != dim:
        q = jnp.pad(q, ((0, 0), (0, n_out - dim)))
    b = bias if bias is not None else jnp.zeros((dim,), jnp.float32)
    b2 = b.astype(jnp.float32).reshape(1, dim)     # bias stays f32 (added in f32)
    if n_out != dim:
        b2 = jnp.pad(b2, ((0, 0), (0, n_out - dim)))

    x_isz = x2.dtype.itemsize
    ci = jnp.dtype(compute_dtype).itemsize
    oi = jnp.dtype(out_dtype).itemsize

    # Per-generation VMEM budget (v5e/v6e: 128 MiB phys -> 96 MiB usable cap;
    # v7x: 64 MiB phys -> ~56 MiB usable).
    try:
        phys = int(pltpu.get_tpu_info().vmem_capacity_bytes)
    except Exception:
        phys = 64 << 20
    budget = max(min(phys - (8 << 20), 96 << 20), 24 << 20)

    a_tm, a_tn, a_tk = _pick_tiles(M, dim, n_out, x_isz, ci, oi, budget)
    tm_user = tm
    tm = a_tm if tm is None else tm
    tn = a_tn if tn is None else tn
    tk = a_tk if tk is None else tk

    # If the whole problem would be a single parallel grid step, split rows so
    # v7x's two TensorCores both get work (never below 128 rows).
    if tm_user is None and pl.cdiv(M, tm) * pl.cdiv(n_out, tn) < 2 and tm >= 256:
        tm = max(128, _round_up(pl.cdiv(tm, 2), 8))

    grid_m = pl.cdiv(M, tm)
    grid_n = pl.cdiv(n_out, tn)
    grid_k = pl.cdiv(dim, tk)
    grid = (grid_m, grid_n, grid_k)

    # Q's block index never changes when it is fully resident -> single-buffer
    # it (frees half the Q VMEM; only worth gating on for non-trivial Q).
    q_bytes = q.shape[0] * q.shape[1] * ci
    single_buf_q = (grid_n == 1 and grid_k == 1 and q_bytes >= (1 << 20)
                    and hasattr(pl, "Buffered"))
    q_index = lambda i, j, k: (k, j)
    if single_buf_q:
        q_spec = pl.BlockSpec((tk, tn), q_index, pipeline_mode=pl.Buffered(1))
    else:
        q_spec = pl.BlockSpec((tk, tn), q_index)

    if grid_k > 1:
        kernel = _make_linear_acc_kernel(compute_dtype, dim, tk)
        scratch_shapes = [pltpu.VMEM((tm, tn), jnp.float32)]
    else:
        kernel = _make_linear_kernel(compute_dtype)
        scratch_shapes = []

    need = _vmem_need(tm, tn, tk, dim, x_isz, ci, oi, 1 if single_buf_q else 2)
    vmem_limit = int(min(max(need + (4 << 20), 32 << 20), phys - (2 << 20)))

    # Q is re-streamed once per row tile whenever it is (N,K)-tiled.
    q_reads = 1 if (grid_n == 1 and grid_k == 1) else grid_m
    cost = pl.CostEstimate(
        flops=2 * M * dim * n_out,
        transcendentals=0,
        bytes_accessed=(M * dim * x_isz + q_reads * dim * n_out * ci
                        + M * n_out * oi + n_out * 4),
    )

    out = pl.pallas_call(
        kernel,
        out_shape=jax.ShapeDtypeStruct((M, n_out), out_dtype),
        grid=grid,
        in_specs=[
            pl.BlockSpec((tm, tk), lambda i, j, k: (i, k)),   # x row / K blocks
            q_spec,                                           # Q: resident or (N,K)-tiled
            pl.BlockSpec((1, tn), lambda i, j, k: (0, j)),    # bias (f32)
        ],
        out_specs=pl.BlockSpec((tm, tn), lambda i, j, k: (i, j)),
        scratch_shapes=scratch_shapes,
        compiler_params=pltpu.CompilerParams(
            dimension_semantics=("parallel", "parallel", "arbitrary"),
            vmem_limit_bytes=vmem_limit,
        ),
        cost_estimate=cost,
    )(x2, q, b2)

    if n_out != dim:
        out = out[:, :dim]
    return out.reshape(*lead, dim)


# ---------------------------------------------------------------------------
# Reference (literal orgqr recurrence, used only for the correctness check).
# ---------------------------------------------------------------------------
def _householder_q_reference(vectors, dim, m):
    v_normed = vectors / jnp.linalg.norm(vectors, axis=1, keepdims=True)
    if m < dim:
        A = jnp.concatenate(
            [v_normed, jnp.zeros((dim - m, dim), vectors.dtype)], axis=0)
    else:
        A = v_normed[:dim, :]
    k = min(m, dim)
    idx = jnp.arange(dim)
    Q = jnp.eye(dim, dtype=vectors.dtype)
    for i in reversed(range(k)):
        col = A[:, i]
        v = jnp.where(idx < i, 0.0, jnp.where(idx == i, 1.0, col))
        Q = Q - 2.0 * jnp.outer(v, v @ Q)
    return Q


if __name__ == "__main__":
    key = jax.random.PRNGKey(0)
    kv, kx = jax.random.split(key)

    dim = 32
    num_reflections = 32          # default: m = dim
    B, S = 2, 8                   # batch=2, seq=8, hidden=32

    # Deterministic parameter init mirroring the module's __init__.
    vectors = jax.random.normal(kv, (num_reflections, dim), dtype=jnp.float32) * 0.01
    bias = jnp.zeros((dim,), dtype=jnp.float32)
    x = jax.random.normal(kx, (B, S, dim), dtype=jnp.float32)

    out = householder_linear(x, vectors, bias)
    out = jax.block_until_ready(out)

    # Pure-JAX reference using the literal sequential Householder recurrence.
    Q_ref = _householder_q_reference(vectors, dim, num_reflections)
    ref = x @ Q_ref + bias

    assert out.shape == x.shape
    scale = float(jnp.max(jnp.abs(ref)))
    max_err = float(jnp.max(jnp.abs(out - ref)))
    assert max_err <= 1e-4 * (1.0 + scale), (max_err, scale)

    print("KERNEL_OK")
</pallas_src>

<mosaic_0001>
module attributes {stable_mosaic.version = 11 : i64} {
  func.func @kernel(%arg0: i32, %arg1: i32, %arg2: i32, %arg3: memref<16x32xf32, #tpu.memory_space<vmem>>, %arg4: memref<32x128xf32, #tpu.memory_space<vmem>>, %arg5: memref<1x128xf32, #tpu.memory_space<vmem>>, %arg6: memref<16x128xf32, #tpu.memory_space<vmem>>) attributes {dimension_semantics = [#tpu.dimension_semantics<parallel>, #tpu.dimension_semantics<parallel>, #tpu.dimension_semantics<arbitrary>], iteration_bounds = array<i64: 1, 1, 1>, scalar_prefetch = 0 : i64, scratch_operands = 0 : i64, tpu.core_type = #tpu.core_type<tc>, window_params = [{transform_indices = @transform_0, window_bounds = array<i64: 16, 32>}, {transform_indices = @transform_1, window_bounds = array<i64: 32, 128>}, {transform_indices = @transform_2, window_bounds = array<i64: 1, 128>}, {transform_indices = @transform_3, window_bounds = array<i64: 16, 128>}]} {
    %c0 = arith.constant 0 : index
    %c0_0 = arith.constant 0 : index
    %0 = vector.load %arg3[%c0, %c0_0] : memref<16x32xf32, #tpu.memory_space<vmem>>, vector<16x32xf32>
    %c0_1 = arith.constant 0 : index
    %c0_2 = arith.constant 0 : index
    %1 = vector.load %arg4[%c0_1, %c0_2] : memref<32x128xf32, #tpu.memory_space<vmem>>, vector<32x128xf32>
    %cst = arith.constant dense<0.000000e+00> : vector<16x128xf32>
    %2 = tpu.matmul %0, %1, %cst {dimension_numbers = #tpu.dot_dimension_numbers<[1], [0], [0], [1], [0, 0, 1, 1], [], []>} : vector<16x32xf32>, vector<32x128xf32>, vector<16x128xf32> -> vector<16x128xf32>
    %c0_3 = arith.constant 0 : index
    %c0_4 = arith.constant 0 : index
    %3 = vector.load %arg5[%c0_3, %c0_4] : memref<1x128xf32, #tpu.memory_space<vmem>>, vector<1x128xf32>
    %4 = vector.broadcast %3 : vector<1x128xf32> to vector<16x128xf32>
    %5 = arith.addf %2, %4 : vector<16x128xf32>
    %c0_5 = arith.constant 0 : index
    %c0_6 = arith.constant 0 : index
    %6 = vector.load %arg6[%c0_5, %c0_6] : memref<16x128xf32, #tpu.memory_space<vmem>>, vector<16x128xf32>
    tpu.vector_store %arg6[%c0_5, %c0_6], %5 {strides = array<i32>} : memref<16x128xf32, #tpu.memory_space<vmem>>, vector<16x128xf32>,
    return
  }
  func.func @transform_0(%arg0: i32, %arg1: i32, %arg2: i32) -> (i32, i32) {
    %c0_i32 = arith.constant 0 : i32
    return %arg0, %arg2 : i32, i32
  }
  func.func @transform_1(%arg0: i32, %arg1: i32, %arg2: i32) -> (i32, i32) {
    %c0_i32 = arith.constant 0 : i32
    return %arg2, %arg1 : i32, i32
  }
  func.func @transform_2(%arg0: i32, %arg1: i32, %arg2: i32) -> (i32, i32) {
    %c0_i32 = arith.constant 0 : i32
    %c0_i32_0 = arith.constant 0 : i32
    return %c0_i32, %arg1 : i32, i32
  }
  func.func @transform_3(%arg0: i32, %arg1: i32, %arg2: i32) -> (i32, i32) {
    %c0_i32 = arith.constant 0 : i32
    return %arg0, %arg1 : i32, i32
  }
}

</mosaic_0001>

<bundles_post_ra>
// kernel: tpu_custom_call.1
= control target key start
LH: loop header
LB: loop body
LE: loop exit
PB: predicated region body
PF: predicated region fallthrough
CT: control target
= control target key end

     0   :  { %8 = vsyncpa [#allocation3], 0  ;;  %s336_s0 = inlined_call_operand.hbm [shape: f32[16,32], index: 0, kind: input, shape index: {}]   ;;  %s337_s1 = inlined_call_operand.hbm [shape: f32[32,128], index: 1, kind: input, shape index: {}]   ;;  %s338_s2 = inlined_call_operand.vmem [shape: f32[1,128], index: 2, kind: input, shape index: {}]   ;;  %s339_s3 = inlined_call_operand.hbm [shape: f32[16,128], index: 3, kind: output, shape index: {}]  }
   0x1   :  { %9 = vsyncpa [#allocation6], 0 }
   0x2   :  { %10 = vsyncpa [#allocation4], 0  ;;  %s263_s12 = smov [#allocation2]   ;;  %s191_s16 = scalar_lea.hbm %s336_s0, 256 }
   0x3   :  { %s16_s13 = sshll.u32 %s263_s12, 4  ;;  %p192_p0 = scmp.ne.s32.totalorder %s336_s0, %s191_s16  ;;  %s17_s13 = int_to_ptr.vmem [resolvable:$true] %s16_s13 }
   0x4   :  { %p195_p1 = scmp.lt.u32.totalorder %s191_s16, %s336_s0 }
   0x6   :  { %p197_p2 = pnand %p195_p1, %p192_p0 }
   0x8   :  { %200 = shalt.err (!%p197_p2)
}
   0x9   :  { %s201_s21 = scalar_lea.vmem %s17_s13, 256  ;;  %p206_p4 = scmp.lt.s32.totalorder %s17_s13, %s17_s13 }
   0xa   :  { %p202_p3 = scmp.ne.s32.totalorder %s17_s13, %s201_s21  ;;  %p207_p5 = scmp.lt.s32.totalorder %s201_s21, %s201_s21 }
   0xc   :  { %p208_p6 = por %p207_p5, %p206_p4 }
   0xe   :  { %p209_p7 = pnand %p208_p6, %p202_p3 }
  0x10   :  { %212 = shalt.err (!%p209_p7)
}
  0x11   :  { %s264_s22 = smov 128   ;;  %s265_s23 = smov 8  }
  0x12   :  { %22 = dma.hbm_to_vmem [thread:$0]  %s336_s0, 256, %s17_s13, [#allocation3], %s264_s22, %s264_s22, %s265_s23  }
  0x13   :  { %s266_s26 = smov [#allocation5]   ;;  %s213_s30 = scalar_lea.hbm %s337_s1, 512 }
  0x14   :  { %s28_s27 = sshll.u32 %s266_s26, 4  ;;  %p214_p8 = scmp.ne.s32.totalorder %s337_s1, %s213_s30  ;;  %s29_s27 = int_to_ptr.vmem [resolvable:$true] %s28_s27 }
  0x15   :  { %p217_p9 = scmp.lt.u32.totalorder %s213_s30, %s337_s1 }
  0x17   :  { %p219_p10 = pnand %p217_p9, %p214_p8 }
  0x19   :  { %222 = shalt.err (!%p219_p10)
}
  0x1a   :  { %s223_s8 = scalar_lea.vmem %s29_s27, 512  ;;  %p228_p12 = scmp.lt.s32.totalorder %s29_s27, %s29_s27 }
  0x1b   :  { %p224_p11 = scmp.ne.s32.totalorder %s29_s27, %s223_s8  ;;  %p229_p13 = scmp.lt.s32.totalorder %s223_s8, %s223_s8 }
  0x1d   :  { %p230_p0 = por %p229_p13, %p228_p12 }
  0x1f   :  { %p231_p1 = pnand %p230_p0, %p224_p11 }
  0x21   :  { %234 = shalt.err (!%p231_p1)
}
  0x22   :  { %34 = dma.hbm_to_vmem [thread:$0]  %s337_s1, 512, %s29_s27, [#allocation6], %s264_s22, %s264_s22, %s265_s23  }
  0x23   :  { %257 = dma.done.wait [#allocation3], 256  }
  0x24   :  { %258 = vsyncadd [#allocation3], 4294967040 }
  0x25   :  { %259 = dma.done.wait [#allocation6], 512  }
  0x26   :  { %260 = vsyncadd [#allocation6], 4294966784  ;;  %vm56_vm0 = vcmask 261120   ;;  %v45_v0 = vld [vmem:[#allocation5] sm:$0xff]  ;;  %v46_v1 = vld [vmem:[#allocation5 + $0x8] sm:$0xff]  ;;  %s267_s11 = smov [#allocation7]  }
  0x27   :  { %v47_v2 = vld [vmem:[#allocation5 + $0x10] sm:$0xff]  ;;  %v178_v3 = vpack.c.bf16 %v46_v1, %v45_v0  ;;  %v48_v4 = vld [vmem:[#allocation5 + $0x18] sm:$0xff]  ;;  %s145_s12 = sshll.u32 %s267_s11, 4  ;;  %s146_s12 = int_to_ptr.vmem [resolvable:$true] %s145_s12 }
  0x28   :  { %v43_v5 = vld [vmem:[#allocation2] sm:$0xff]  ;;  %v182_v6 = vpack.c.bf16 %v48_v4, %v47_v2  ;;  %v44_v7 = vld [vmem:[#allocation2 + $0x8] sm:$0xff]  ;;  %s235_s13 = scalar_lea.vmem %s146_s12, 256  ;;  %p240_p3 = scmp.lt.s32.totalorder %s146_s12, %s146_s12 }
  0x29   :  { %175 = vmatprep.mubr.msk.f32.mxu0 %vm56_vm0, %v43_v5  ;;  %179 = vmatprep.subr.bf16.mxu0 %v178_v3  ;;  %v158_v8 = vld [vmem:[%s338_s2] ss:$0 sm:$0xff]  ;;  %p236_p2 = scmp.ne.s32.totalorder %s146_s12, %s235_s13  ;;  %p241_p4 = scmp.lt.s32.totalorder %s235_s13, %s235_s13 }
  0x2a   :  { %181 = vmatpush3.bf16.msra.mxu0 %v178_v3 }
  0x2b   :  { %183 = vmatprep.subr.bf16.mxu0 %v182_v6  ;;  %p242_p5 = por %p241_p4, %p240_p3 }
  0x2d   :  { %p243_p6 = pnand %p242_p5, %p236_p2 }
  0x2e   :  { %185 = vmatpush3.bf16.msra.mxu0 %v182_v6 }
  0x31   :  { %176 = vmatmul.mubr.msk.f32.vlgmr.msra.gmra.mrb[0].mxu0 %vm56_vm0, %v44_v7 }
 0x104   :  { %v177_v9 = vpop.f32.mrb[0].mxu0 }
 0x105   :  { %v135_v10 = vadd.f32 %v177_v9, %v158_v8  ;;  %v129_v11 = vpop.f32.mrb[1].mxu0 }
 0x106   :  { %v130_v12 = vadd.f32 %v158_v8, %v129_v11 }
 0x107   :  { %139 = vst [vmem:[#allocation7 + $0x8] sm:$0xff] %v135_v10 }
 0x108   :  { %138 = vst [vmem:[#allocation7] sm:$0xff] %v130_v12 }
 0x109   :  { %246 = shalt.err (!%p243_p6)
}
 0x10a   :  { %s247_s2 = scalar_lea.hbm %s339_s3, 256 }
 0x10b   :  { %p248_p7 = scmp.ne.s32.totalorder %s339_s3, %s247_s2  ;;  %p251_p8 = scmp.lt.u32.totalorder %s247_s2, %s339_s3 }
 0x10d   :  { %p253_p9 = pnand %p251_p8, %p248_p7 }
 0x10f   :  { %256 = shalt.err (!%p253_p9)
}
 0x110   :  { %151 = dma.vmem_to_hbm [thread:$0]  %s146_s12, 256, %s339_s3, [#allocation4], %s264_s22, %s264_s22, %s265_s23  }
 0x111   :  { %261 = dma.done.wait [#allocation4], 256  }
 0x112   :  { %262 = vsyncadd [#allocation4], 4294967040 }
 0x113   :  { %155 = vsyncpa [#allocation3], 1 }
 0x114   :  { %156 = vsyncpa [#allocation6], 1 }
 0x115   :  { %157 = vsyncpa [#allocation4], 1 }

</bundles_post_ra>
